<compile_context>
chip_gen: v7x
topology: tpu7x:2x2x1
jax: 0.10.0
libtpu: 0.0.40
codegen_flags: <defaults>
</compile_context>

<pallas_src>
import functools
import math

import jax
import jax.numpy as jnp
from jax import lax
from jax.experimental import pallas as pl
from jax.experimental.pallas import tpu as pltpu


def _round_up(x, m):
    return ((x + m - 1) // m) * m


def _conv_lrelu_kernel(x_ref, w_ref, o_ref, patches_ref, *,
                       tap_offsets, C_in, taps_per_slab, NB, LANES,
                       neg_slope, activation):
    """Fused im2col + single MXU matmul + LeakyReLU for one batch group.

    x_ref:       (1, NB, C_in, L)          bf16  padded, row-major-flattened input
    w_ref:       (C_out_conv, K)           bf16  pre-reshaped conv weights
    o_ref:       (1, C_out_conv, NB*LANES) f32   conv output on the padded-W grid
    patches_ref: (K, NB*LANES)             bf16  im2col scratch (packed slabs)
    """
    rows = taps_per_slab * C_in                 # 16 for C_in=4: full packed bf16 vregs
    n_slabs = len(tap_offsets) // taps_per_slab

    for n in range(NB):                         # static, unrolled (NB <= 2 here)
        x = x_ref[0, n]                         # (C_in, L) bf16, loaded once
        for s in range(n_slabs):                # 7 packed slab stores instead of 25
            offs = tap_offsets[s * taps_per_slab:(s + 1) * taps_per_slab]
            slab = jnp.concatenate([x[:, off:off + LANES] for off in offs], axis=0)
            patches_ref[s * rows:(s + 1) * rows, n * LANES:(n + 1) * LANES] = slab

    acc = jnp.dot(w_ref[...], patches_ref[...],            # (C_out_conv, NB*LANES)
                  preferred_element_type=jnp.float32)
    if activation:                                          # trace-time branch
        acc = jnp.where(acc >= 0, acc, neg_slope * acc)
    o_ref[0] = acc.astype(o_ref.dtype)


def upsample_conv2d_pixel_shuffle(x_nchw, weight_oihw, *, kernel_size=5,
                                  upscale_factor=2, negative_slope=0.2,
                                  activation=True):
    N, C_in, H, W = x_nchw.shape
    C_out_conv = weight_oihw.shape[0]
    KH = KW = kernel_size
    pad = kernel_size // 2
    r = upscale_factor
    C_out = C_out_conv // (r * r)
    Hp, Wp = H + 2 * pad, W + 2 * pad

    HWp = H * Wp                                  # valid rows on the padded-W grid
    LANES = _round_up(HWp, 128)                   # lane-dense compute width per batch
    max_off = (KH - 1) * Wp + (KW - 1)
    L = _round_up(max(Hp * Wp, max_off + LANES), 128)   # every tap slice in-bounds

    # Tap grouping: pack whole taps (C_in real channels each, no zero padding)
    # into slabs whose row count is a multiple of 16 -> fully packed bf16 stores.
    taps_per_slab = 16 // math.gcd(16, C_in)
    n_taps = KH * KW
    n_taps_pad = _round_up(n_taps, taps_per_slab)
    K = n_taps_pad * C_in

    tap_offsets = tuple(kh * Wp + kw for kh in range(KH) for kw in range(KW))
    tap_offsets = tap_offsets + (0,) * (n_taps_pad - n_taps)   # fake taps (zero weights)

    # Batch grouping: collapse batches into the lane axis on single-TensorCore
    # chips (v5e/v6e); keep >=2 parallel grid steps on 2-TC chips (v7x).
    try:
        kind = jax.devices()[0].device_kind.lower()
    except Exception:
        kind = ""
    two_core = "7" in kind                        # v7x has 2 TensorCores per chip
    nb_cap = 1 if two_core else max(1, 2048 // LANES)
    NB = max(d for d in range(1, N + 1) if N % d == 0 and d <= nb_cap)
    num_groups = N // NB

    # Glue (fused under jit): spatial pad, flatten, lane-pad to L, bf16, group.
    x_p = jnp.pad(x_nchw.astype(jnp.bfloat16),
                  ((0, 0), (0, 0), (pad, pad), (pad, pad)))
    x_flat = x_p.reshape(N, C_in, Hp * Wp)
    x_flat = jnp.pad(x_flat, ((0, 0), (0, 0), (0, L - Hp * Wp)))
    x_flat = x_flat.reshape(num_groups, NB, C_in, L)

    # Weight OIHW -> (C_out_conv, K) with K ordered (tap, channel); fake taps zero.
    w_t = jnp.transpose(weight_oihw, (0, 2, 3, 1)).reshape(C_out_conv, n_taps, C_in)
    w_t = jnp.pad(w_t, ((0, 0), (0, n_taps_pad - n_taps), (0, 0)))
    w_mat = w_t.reshape(C_out_conv, K).astype(jnp.bfloat16)

    kernel = functools.partial(
        _conv_lrelu_kernel, tap_offsets=tap_offsets, C_in=C_in,
        taps_per_slab=taps_per_slab, NB=NB, LANES=LANES,
        neg_slope=negative_slope, activation=activation)

    flops = 2 * N * C_out_conv * (KH * KW * C_in) * HWp
    bytes_accessed = (x_flat.size * 2 + w_mat.size * 2
                      + num_groups * C_out_conv * NB * LANES * 4)

    conv_out = pl.pallas_call(
        kernel,
        out_shape=jax.ShapeDtypeStruct((num_groups, C_out_conv, NB * LANES),
                                       jnp.float32),
        grid_spec=pltpu.PrefetchScalarGridSpec(
            num_scalar_prefetch=0,
            grid=(num_groups,),
            in_specs=[
                pl.BlockSpec((1, NB, C_in, L), lambda g: (g, 0, 0, 0)),
                pl.BlockSpec((C_out_conv, K), lambda g: (0, 0)),
            ],
            out_specs=pl.BlockSpec((1, C_out_conv, NB * LANES),
                                   lambda g: (g, 0, 0)),
            scratch_shapes=[pltpu.VMEM((K, NB * LANES), jnp.bfloat16)],
        ),
        compiler_params=pltpu.CompilerParams(
            dimension_semantics=("parallel" if num_groups > 1 else "arbitrary",)),
        cost_estimate=pl.CostEstimate(flops=flops, transcendentals=0,
                                      bytes_accessed=bytes_accessed),
    )(x_flat, w_mat)

    # Glue: ungroup batches, crop padded-width grid, PixelShuffle (one fused
    # reshape/transpose chain):  channel c*r*r + i*r + j -> out[c, h*r+i, w*r+j].
    y = conv_out.reshape(num_groups, C_out_conv, NB, LANES)
    y = jnp.transpose(y, (0, 2, 1, 3)).reshape(N, C_out_conv, LANES)
    y = y[:, :, :HWp].reshape(N, C_out, r, r, H, Wp)
    y = jnp.transpose(y, (0, 1, 4, 2, 5, 3))          # (N, C_out, H, r, Wp, r)
    y = y[:, :, :, :, :W, :]                          # drop padded-W columns
    y = y.reshape(N, C_out, H * r, W * r)
    return y.astype(x_nchw.dtype)


if __name__ == "__main__":
    key = jax.random.PRNGKey(0)
    kx, kw_key = jax.random.split(key)

    N, C_in, H, W = 2, 4, 16, 16
    out_channels = 4
    kernel_size = 5
    upscale_factor = 2
    negative_slope = 0.2
    C_out_conv = out_channels * 2 ** upscale_factor   # matches the PyTorch module (=16)

    x = jax.random.normal(kx, (N, C_in, H, W), dtype=jnp.float32)

    # Deterministic kaiming_uniform_(a=0.2, nonlinearity='leaky_relu') equivalent
    fan_in = C_in * kernel_size * kernel_size
    gain = math.sqrt(2.0 / (1.0 + negative_slope ** 2))
    bound = gain * math.sqrt(3.0 / fan_in)
    weight = jax.random.uniform(
        kw_key, (C_out_conv, C_in, kernel_size, kernel_size),
        dtype=jnp.float32, minval=-bound, maxval=bound)

    fwd = jax.jit(functools.partial(
        upsample_conv2d_pixel_shuffle, kernel_size=kernel_size,
        upscale_factor=upscale_factor, negative_slope=negative_slope,
        activation=True))
    out = jax.block_until_ready(fwd(x, weight))

    # Pure-JAX reference (conv -> pixel shuffle -> leaky relu).  Kernel MXU
    # operands are bf16, so round reference inputs to bf16 too: products match
    # exactly and only f32 summation order differs.
    xq = x.astype(jnp.bfloat16).astype(jnp.float32)
    wq = weight.astype(jnp.bfloat16).astype(jnp.float32)
    ref_conv = lax.conv_general_dilated(
        xq, wq, window_strides=(1, 1), padding="SAME",
        dimension_numbers=("NCHW", "OIHW", "NCHW"),
        precision=lax.Precision.HIGHEST)
    r = upscale_factor
    ref = ref_conv.reshape(N, out_channels, r, r, H, W)
    ref = jnp.transpose(ref, (0, 1, 4, 2, 5, 3)).reshape(N, out_channels, H * r, W * r)
    ref = jnp.where(ref >= 0, ref, negative_slope * ref)

    assert out.shape == (N, out_channels, H * r, W * r)
    max_err = float(jnp.max(jnp.abs(out - ref)))
    assert jnp.allclose(out, ref, atol=1e-3, rtol=1e-3), max_err
    print("KERNEL_OK")
</pallas_src>

<mosaic_0001>
module attributes {stable_mosaic.version = 11 : i64} {
  func.func @_conv_lrelu_kernel(%arg0: i32, %arg1: memref<1x2x4x512xbf16, #tpu.memory_space<vmem>>, %arg2: memref<16x112xbf16, #tpu.memory_space<vmem>>, %arg3: memref<1x16x768xf32, #tpu.memory_space<vmem>>, %arg4: memref<112x768xbf16, #tpu.memory_space<vmem>>) attributes {dimension_semantics = [#tpu.dimension_semantics<arbitrary>], iteration_bounds = array<i64: 1>, scalar_prefetch = 0 : i64, scratch_operands = 1 : i64, tpu.core_type = #tpu.core_type<tc>, window_params = [{transform_indices = @transform_0, window_bounds = array<i64: 1, 2, 4, 512>}, {pipeline_mode = #tpu.pipeline_mode<synchronous>, transform_indices = @transform_1, window_bounds = array<i64: 16, 112>}, {transform_indices = @transform_2, window_bounds = array<i64: 1, 16, 768>}]} {
    %c0 = arith.constant 0 : index
    %c0_0 = arith.constant 0 : index
    %c0_1 = arith.constant 0 : index
    %c0_2 = arith.constant 0 : index
    %0 = vector.load %arg1[%c0, %c0_0, %c0_1, %c0_2] : memref<1x2x4x512xbf16, #tpu.memory_space<vmem>>, vector<1x1x4x512xbf16>
    %1 = vector.shape_cast %0 : vector<1x1x4x512xbf16> to vector<4x512xbf16>
    %2 = vector.extract_strided_slice %1 {offsets = [0, 0], sizes = [4, 384], strides = [1, 1]} : vector<4x512xbf16> to vector<4x384xbf16>
    %3 = vector.extract_strided_slice %1 {offsets = [0, 1], sizes = [4, 384], strides = [1, 1]} : vector<4x512xbf16> to vector<4x384xbf16>
    %4 = vector.extract_strided_slice %1 {offsets = [0, 2], sizes = [4, 384], strides = [1, 1]} : vector<4x512xbf16> to vector<4x384xbf16>
    %5 = vector.extract_strided_slice %1 {offsets = [0, 3], sizes = [4, 384], strides = [1, 1]} : vector<4x512xbf16> to vector<4x384xbf16>
    %6 = tpu.concatenate %2, %3, %4, %5 in 0 : vector<4x384xbf16>, vector<4x384xbf16>, vector<4x384xbf16>, vector<4x384xbf16> -> vector<16x384xbf16>
    %c0_3 = arith.constant 0 : index
    %c0_4 = arith.constant 0 : index
    %7 = vector.load %arg4[%c0_3, %c0_4] : memref<112x768xbf16, #tpu.memory_space<vmem>>, vector<16x384xbf16>
    tpu.vector_store %arg4[%c0_3, %c0_4], %6 {strides = array<i32>} : memref<112x768xbf16, #tpu.memory_space<vmem>>, vector<16x384xbf16>,
    %8 = vector.extract_strided_slice %1 {offsets = [0, 4], sizes = [4, 384], strides = [1, 1]} : vector<4x512xbf16> to vector<4x384xbf16>
    %9 = vector.extract_strided_slice %1 {offsets = [0, 20], sizes = [4, 384], strides = [1, 1]} : vector<4x512xbf16> to vector<4x384xbf16>
    %10 = vector.extract_strided_slice %1 {offsets = [0, 21], sizes = [4, 384], strides = [1, 1]} : vector<4x512xbf16> to vector<4x384xbf16>
    %11 = vector.extract_strided_slice %1 {offsets = [0, 22], sizes = [4, 384], strides = [1, 1]} : vector<4x512xbf16> to vector<4x384xbf16>
    %12 = tpu.concatenate %8, %9, %10, %11 in 0 : vector<4x384xbf16>, vector<4x384xbf16>, vector<4x384xbf16>, vector<4x384xbf16> -> vector<16x384xbf16>
    %c16 = arith.constant 16 : index
    %c0_5 = arith.constant 0 : index
    %13 = vector.load %arg4[%c16, %c0_5] : memref<112x768xbf16, #tpu.memory_space<vmem>>, vector<16x384xbf16>
    tpu.vector_store %arg4[%c16, %c0_5], %12 {strides = array<i32>} : memref<112x768xbf16, #tpu.memory_space<vmem>>, vector<16x384xbf16>,
    %14 = vector.extract_strided_slice %1 {offsets = [0, 23], sizes = [4, 384], strides = [1, 1]} : vector<4x512xbf16> to vector<4x384xbf16>
    %15 = vector.extract_strided_slice %1 {offsets = [0, 24], sizes = [4, 384], strides = [1, 1]} : vector<4x512xbf16> to vector<4x384xbf16>
    %16 = vector.extract_strided_slice %1 {offsets = [0, 40], sizes = [4, 384], strides = [1, 1]} : vector<4x512xbf16> to vector<4x384xbf16>
    %17 = vector.extract_strided_slice %1 {offsets = [0, 41], sizes = [4, 384], strides = [1, 1]} : vector<4x512xbf16> to vector<4x384xbf16>
    %18 = tpu.concatenate %14, %15, %16, %17 in 0 : vector<4x384xbf16>, vector<4x384xbf16>, vector<4x384xbf16>, vector<4x384xbf16> -> vector<16x384xbf16>
    %c32 = arith.constant 32 : index
    %c0_6 = arith.constant 0 : index
    %19 = vector.load %arg4[%c32, %c0_6] : memref<112x768xbf16, #tpu.memory_space<vmem>>, vector<16x384xbf16>
    tpu.vector_store %arg4[%c32, %c0_6], %18 {strides = array<i32>} : memref<112x768xbf16, #tpu.memory_space<vmem>>, vector<16x384xbf16>,
    %20 = vector.extract_strided_slice %1 {offsets = [0, 42], sizes = [4, 384], strides = [1, 1]} : vector<4x512xbf16> to vector<4x384xbf16>
    %21 = vector.extract_strided_slice %1 {offsets = [0, 43], sizes = [4, 384], strides = [1, 1]} : vector<4x512xbf16> to vector<4x384xbf16>
    %22 = vector.extract_strided_slice %1 {offsets = [0, 44], sizes = [4, 384], strides = [1, 1]} : vector<4x512xbf16> to vector<4x384xbf16>
    %23 = vector.extract_strided_slice %1 {offsets = [0, 60], sizes = [4, 384], strides = [1, 1]} : vector<4x512xbf16> to vector<4x384xbf16>
    %24 = tpu.concatenate %20, %21, %22, %23 in 0 : vector<4x384xbf16>, vector<4x384xbf16>, vector<4x384xbf16>, vector<4x384xbf16> -> vector<16x384xbf16>
    %c48 = arith.constant 48 : index
    %c0_7 = arith.constant 0 : index
    %25 = vector.load %arg4[%c48, %c0_7] : memref<112x768xbf16, #tpu.memory_space<vmem>>, vector<16x384xbf16>
    tpu.vector_store %arg4[%c48, %c0_7], %24 {strides = array<i32>} : memref<112x768xbf16, #tpu.memory_space<vmem>>, vector<16x384xbf16>,
    %26 = vector.extract_strided_slice %1 {offsets = [0, 61], sizes = [4, 384], strides = [1, 1]} : vector<4x512xbf16> to vector<4x384xbf16>
    %27 = vector.extract_strided_slice %1 {offsets = [0, 62], sizes = [4, 384], strides = [1, 1]} : vector<4x512xbf16> to vector<4x384xbf16>
    %28 = vector.extract_strided_slice %1 {offsets = [0, 63], sizes = [4, 384], strides = [1, 1]} : vector<4x512xbf16> to vector<4x384xbf16>
    %29 = vector.extract_strided_slice %1 {offsets = [0, 64], sizes = [4, 384], strides = [1, 1]} : vector<4x512xbf16> to vector<4x384xbf16>
    %30 = tpu.concatenate %26, %27, %28, %29 in 0 : vector<4x384xbf16>, vector<4x384xbf16>, vector<4x384xbf16>, vector<4x384xbf16> -> vector<16x384xbf16>
    %c64 = arith.constant 64 : index
    %c0_8 = arith.constant 0 : index
    %31 = vector.load %arg4[%c64, %c0_8] : memref<112x768xbf16, #tpu.memory_space<vmem>>, vector<16x384xbf16>
    tpu.vector_store %arg4[%c64, %c0_8], %30 {strides = array<i32>} : memref<112x768xbf16, #tpu.memory_space<vmem>>, vector<16x384xbf16>,
    %32 = vector.extract_strided_slice %1 {offsets = [0, 80], sizes = [4, 384], strides = [1, 1]} : vector<4x512xbf16> to vector<4x384xbf16>
    %33 = vector.extract_strided_slice %1 {offsets = [0, 81], sizes = [4, 384], strides = [1, 1]} : vector<4x512xbf16> to vector<4x384xbf16>
    %34 = vector.extract_strided_slice %1 {offsets = [0, 82], sizes = [4, 384], strides = [1, 1]} : vector<4x512xbf16> to vector<4x384xbf16>
    %35 = vector.extract_strided_slice %1 {offsets = [0, 83], sizes = [4, 384], strides = [1, 1]} : vector<4x512xbf16> to vector<4x384xbf16>
    %36 = tpu.concatenate %32, %33, %34, %35 in 0 : vector<4x384xbf16>, vector<4x384xbf16>, vector<4x384xbf16>, vector<4x384xbf16> -> vector<16x384xbf16>
    %c80 = arith.constant 80 : index
    %c0_9 = arith.constant 0 : index
    %37 = vector.load %arg4[%c80, %c0_9] : memref<112x768xbf16, #tpu.memory_space<vmem>>, vector<16x384xbf16>
    tpu.vector_store %arg4[%c80, %c0_9], %36 {strides = array<i32>} : memref<112x768xbf16, #tpu.memory_space<vmem>>, vector<16x384xbf16>,
    %38 = vector.extract_strided_slice %1 {offsets = [0, 84], sizes = [4, 384], strides = [1, 1]} : vector<4x512xbf16> to vector<4x384xbf16>
    %39 = vector.extract_strided_slice %1 {offsets = [0, 0], sizes = [4, 384], strides = [1, 1]} : vector<4x512xbf16> to vector<4x384xbf16>
    %40 = vector.extract_strided_slice %1 {offsets = [0, 0], sizes = [4, 384], strides = [1, 1]} : vector<4x512xbf16> to vector<4x384xbf16>
    %41 = vector.extract_strided_slice %1 {offsets = [0, 0], sizes = [4, 384], strides = [1, 1]} : vector<4x512xbf16> to vector<4x384xbf16>
    %42 = tpu.concatenate %38, %39, %40, %41 in 0 : vector<4x384xbf16>, vector<4x384xbf16>, vector<4x384xbf16>, vector<4x384xbf16> -> vector<16x384xbf16>
    %c96 = arith.constant 96 : index
    %c0_10 = arith.constant 0 : index
    %43 = vector.load %arg4[%c96, %c0_10] : memref<112x768xbf16, #tpu.memory_space<vmem>>, vector<16x384xbf16>
    tpu.vector_store %arg4[%c96, %c0_10], %42 {strides = array<i32>} : memref<112x768xbf16, #tpu.memory_space<vmem>>, vector<16x384xbf16>,
    %c0_11 = arith.constant 0 : index
    %c1 = arith.constant 1 : index
    %c0_12 = arith.constant 0 : index
    %c0_13 = arith.constant 0 : index
    %44 = vector.load %arg1[%c0_11, %c1, %c0_12, %c0_13] : memref<1x2x4x512xbf16, #tpu.memory_space<vmem>>, vector<1x1x4x512xbf16>
    %45 = vector.shape_cast %44 : vector<1x1x4x512xbf16> to vector<4x512xbf16>
    %46 = vector.extract_strided_slice %45 {offsets = [0, 0], sizes = [4, 384], strides = [1, 1]} : vector<4x512xbf16> to vector<4x384xbf16>
    %47 = vector.extract_strided_slice %45 {offsets = [0, 1], sizes = [4, 384], strides = [1, 1]} : vector<4x512xbf16> to vector<4x384xbf16>
    %48 = vector.extract_strided_slice %45 {offsets = [0, 2], sizes = [4, 384], strides = [1, 1]} : vector<4x512xbf16> to vector<4x384xbf16>
    %49 = vector.extract_strided_slice %45 {offsets = [0, 3], sizes = [4, 384], strides = [1, 1]} : vector<4x512xbf16> to vector<4x384xbf16>
    %50 = tpu.concatenate %46, %47, %48, %49 in 0 : vector<4x384xbf16>, vector<4x384xbf16>, vector<4x384xbf16>, vector<4x384xbf16> -> vector<16x384xbf16>
    %c0_14 = arith.constant 0 : index
    %c384 = arith.constant 384 : index
    %51 = vector.load %arg4[%c0_14, %c384] : memref<112x768xbf16, #tpu.memory_space<vmem>>, vector<16x384xbf16>
    tpu.vector_store %arg4[%c0_14, %c384], %50 {strides = array<i32>} : memref<112x768xbf16, #tpu.memory_space<vmem>>, vector<16x384xbf16>,
    %52 = vector.extract_strided_slice %45 {offsets = [0, 4], sizes = [4, 384], strides = [1, 1]} : vector<4x512xbf16> to vector<4x384xbf16>
    %53 = vector.extract_strided_slice %45 {offsets = [0, 20], sizes = [4, 384], strides = [1, 1]} : vector<4x512xbf16> to vector<4x384xbf16>
    %54 = vector.extract_strided_slice %45 {offsets = [0, 21], sizes = [4, 384], strides = [1, 1]} : vector<4x512xbf16> to vector<4x384xbf16>
    %55 = vector.extract_strided_slice %45 {offsets = [0, 22], sizes = [4, 384], strides = [1, 1]} : vector<4x512xbf16> to vector<4x384xbf16>
    %56 = tpu.concatenate %52, %53, %54, %55 in 0 : vector<4x384xbf16>, vector<4x384xbf16>, vector<4x384xbf16>, vector<4x384xbf16> -> vector<16x384xbf16>
    %c16_15 = arith.constant 16 : index
    %c384_16 = arith.constant 384 : index
    %57 = vector.load %arg4[%c16_15, %c384_16] : memref<112x768xbf16, #tpu.memory_space<vmem>>, vector<16x384xbf16>
    tpu.vector_store %arg4[%c16_15, %c384_16], %56 {strides = array<i32>} : memref<112x768xbf16, #tpu.memory_space<vmem>>, vector<16x384xbf16>,
    %58 = vector.extract_strided_slice %45 {offsets = [0, 23], sizes = [4, 384], strides = [1, 1]} : vector<4x512xbf16> to vector<4x384xbf16>
    %59 = vector.extract_strided_slice %45 {offsets = [0, 24], sizes = [4, 384], strides = [1, 1]} : vector<4x512xbf16> to vector<4x384xbf16>
    %60 = vector.extract_strided_slice %45 {offsets = [0, 40], sizes = [4, 384], strides = [1, 1]} : vector<4x512xbf16> to vector<4x384xbf16>
    %61 = vector.extract_strided_slice %45 {offsets = [0, 41], sizes = [4, 384], strides = [1, 1]} : vector<4x512xbf16> to vector<4x384xbf16>
    %62 = tpu.concatenate %58, %59, %60, %61 in 0 : vector<4x384xbf16>, vector<4x384xbf16>, vector<4x384xbf16>, vector<4x384xbf16> -> vector<16x384xbf16>
    %c32_17 = arith.constant 32 : index
    %c384_18 = arith.constant 384 : index
    %63 = vector.load %arg4[%c32_17, %c384_18] : memref<112x768xbf16, #tpu.memory_space<vmem>>, vector<16x384xbf16>
    tpu.vector_store %arg4[%c32_17, %c384_18], %62 {strides = array<i32>} : memref<112x768xbf16, #tpu.memory_space<vmem>>, vector<16x384xbf16>,
    %64 = vector.extract_strided_slice %45 {offsets = [0, 42], sizes = [4, 384], strides = [1, 1]} : vector<4x512xbf16> to vector<4x384xbf16>
    %65 = vector.extract_strided_slice %45 {offsets = [0, 43], sizes = [4, 384], strides = [1, 1]} : vector<4x512xbf16> to vector<4x384xbf16>
    %66 = vector.extract_strided_slice %45 {offsets = [0, 44], sizes = [4, 384], strides = [1, 1]} : vector<4x512xbf16> to vector<4x384xbf16>
    %67 = vector.extract_strided_slice %45 {offsets = [0, 60], sizes = [4, 384], strides = [1, 1]} : vector<4x512xbf16> to vector<4x384xbf16>
    %68 = tpu.concatenate %64, %65, %66, %67 in 0 : vector<4x384xbf16>, vector<4x384xbf16>, vector<4x384xbf16>, vector<4x384xbf16> -> vector<16x384xbf16>
    %c48_19 = arith.constant 48 : index
    %c384_20 = arith.constant 384 : index
    %69 = vector.load %arg4[%c48_19, %c384_20] : memref<112x768xbf16, #tpu.memory_space<vmem>>, vector<16x384xbf16>
    tpu.vector_store %arg4[%c48_19, %c384_20], %68 {strides = array<i32>} : memref<112x768xbf16, #tpu.memory_space<vmem>>, vector<16x384xbf16>,
    %70 = vector.extract_strided_slice %45 {offsets = [0, 61], sizes = [4, 384], strides = [1, 1]} : vector<4x512xbf16> to vector<4x384xbf16>
    %71 = vector.extract_strided_slice %45 {offsets = [0, 62], sizes = [4, 384], strides = [1, 1]} : vector<4x512xbf16> to vector<4x384xbf16>
    %72 = vector.extract_strided_slice %45 {offsets = [0, 63], sizes = [4, 384], strides = [1, 1]} : vector<4x512xbf16> to vector<4x384xbf16>
    %73 = vector.extract_strided_slice %45 {offsets = [0, 64], sizes = [4, 384], strides = [1, 1]} : vector<4x512xbf16> to vector<4x384xbf16>
    %74 = tpu.concatenate %70, %71, %72, %73 in 0 : vector<4x384xbf16>, vector<4x384xbf16>, vector<4x384xbf16>, vector<4x384xbf16> -> vector<16x384xbf16>
    %c64_21 = arith.constant 64 : index
    %c384_22 = arith.constant 384 : index
    %75 = vector.load %arg4[%c64_21, %c384_22] : memref<112x768xbf16, #tpu.memory_space<vmem>>, vector<16x384xbf16>
    tpu.vector_store %arg4[%c64_21, %c384_22], %74 {strides = array<i32>} : memref<112x768xbf16, #tpu.memory_space<vmem>>, vector<16x384xbf16>,
    %76 = vector.extract_strided_slice %45 {offsets = [0, 80], sizes = [4, 384], strides = [1, 1]} : vector<4x512xbf16> to vector<4x384xbf16>
    %77 = vector.extract_strided_slice %45 {offsets = [0, 81], sizes = [4, 384], strides = [1, 1]} : vector<4x512xbf16> to vector<4x384xbf16>
    %78 = vector.extract_strided_slice %45 {offsets = [0, 82], sizes = [4, 384], strides = [1, 1]} : vector<4x512xbf16> to vector<4x384xbf16>
    %79 = vector.extract_strided_slice %45 {offsets = [0, 83], sizes = [4, 384], strides = [1, 1]} : vector<4x512xbf16> to vector<4x384xbf16>
    %80 = tpu.concatenate %76, %77, %78, %79 in 0 : vector<4x384xbf16>, vector<4x384xbf16>, vector<4x384xbf16>, vector<4x384xbf16> -> vector<16x384xbf16>
    %c80_23 = arith.constant 80 : index
    %c384_24 = arith.constant 384 : index
    %81 = vector.load %arg4[%c80_23, %c384_24] : memref<112x768xbf16, #tpu.memory_space<vmem>>, vector<16x384xbf16>
    tpu.vector_store %arg4[%c80_23, %c384_24], %80 {strides = array<i32>} : memref<112x768xbf16, #tpu.memory_space<vmem>>, vector<16x384xbf16>,
    %82 = vector.extract_strided_slice %45 {offsets = [0, 84], sizes = [4, 384], strides = [1, 1]} : vector<4x512xbf16> to vector<4x384xbf16>
    %83 = vector.extract_strided_slice %45 {offsets = [0, 0], sizes = [4, 384], strides = [1, 1]} : vector<4x512xbf16> to vector<4x384xbf16>
    %84 = vector.extract_strided_slice %45 {offsets = [0, 0], sizes = [4, 384], strides = [1, 1]} : vector<4x512xbf16> to vector<4x384xbf16>
    %85 = vector.extract_strided_slice %45 {offsets = [0, 0], sizes = [4, 384], strides = [1, 1]} : vector<4x512xbf16> to vector<4x384xbf16>
    %86 = tpu.concatenate %82, %83, %84, %85 in 0 : vector<4x384xbf16>, vector<4x384xbf16>, vector<4x384xbf16>, vector<4x384xbf16> -> vector<16x384xbf16>
    %c96_25 = arith.constant 96 : index
    %c384_26 = arith.constant 384 : index
    %87 = vector.load %arg4[%c96_25, %c384_26] : memref<112x768xbf16, #tpu.memory_space<vmem>>, vector<16x384xbf16>
    tpu.vector_store %arg4[%c96_25, %c384_26], %86 {strides = array<i32>} : memref<112x768xbf16, #tpu.memory_space<vmem>>, vector<16x384xbf16>,
    %c0_27 = arith.constant 0 : index
    %c0_28 = arith.constant 0 : index
    %88 = vector.load %arg2[%c0_27, %c0_28] : memref<16x112xbf16, #tpu.memory_space<vmem>>, vector<16x112xbf16>
    %c0_29 = arith.constant 0 : index
    %c0_30 = arith.constant 0 : index
    %89 = vector.load %arg4[%c0_29, %c0_30] : memref<112x768xbf16, #tpu.memory_space<vmem>>, vector<112x768xbf16>
    %cst = arith.constant dense<0.000000e+00> : vector<16x768xf32>
    %90 = tpu.matmul %88, %89, %cst {dimension_numbers = #tpu.dot_dimension_numbers<[1], [0], [0], [1], [0, 0, 1, 1], [], []>} : vector<16x112xbf16>, vector<112x768xbf16>, vector<16x768xf32> -> vector<16x768xf32>
    %cst_31 = arith.constant 0.000000e+00 : f32
    %91 = vector.broadcast %cst_31 : f32 to vector<16x768xf32>
    %92 = arith.cmpf oge, %90, %91 : vector<16x768xf32>
    %cst_32 = arith.constant 2.000000e-01 : f32
    %93 = vector.broadcast %cst_32 : f32 to vector<16x768xf32>
    %94 = arith.mulf %93, %90 : vector<16x768xf32>
    %95 = arith.select %92, %90, %94 : vector<16x768xi1>, vector<16x768xf32>
    %c0_33 = arith.constant 0 : index
    %c0_34 = arith.constant 0 : index
    %c0_35 = arith.constant 0 : index
    %96 = vector.load %arg3[%c0_33, %c0_34, %c0_35] : memref<1x16x768xf32, #tpu.memory_space<vmem>>, vector<1x16x768xf32>
    %97 = vector.shape_cast %96 : vector<1x16x768xf32> to vector<16x768xf32>
    %98 = vector.shape_cast %95 : vector<16x768xf32> to vector<1x16x768xf32>
    tpu.vector_store %arg3[%c0_33, %c0_34, %c0_35], %98 {strides = array<i32>} : memref<1x16x768xf32, #tpu.memory_space<vmem>>, vector<1x16x768xf32>,
    return
  }
  func.func @transform_0(%arg0: i32) -> (i32, i32, i32, i32) {
    %c0_i32 = arith.constant 0 : i32
    %c0_i32_0 = arith.constant 0 : i32
    %c0_i32_1 = arith.constant 0 : i32
    %c0_i32_2 = arith.constant 0 : i32
    return %arg0, %c0_i32, %c0_i32_0, %c0_i32_1 : i32, i32, i32, i32
  }
  func.func @transform_1(%arg0: i32) -> (i32, i32) {
    %c0_i32 = arith.constant 0 : i32
    %c0_i32_0 = arith.constant 0 : i32
    %c0_i32_1 = arith.constant 0 : i32
    return %c0_i32, %c0_i32_0 : i32, i32
  }
  func.func @transform_2(%arg0: i32) -> (i32, i32, i32) {
    %c0_i32 = arith.constant 0 : i32
    %c0_i32_0 = arith.constant 0 : i32
    %c0_i32_1 = arith.constant 0 : i32
    return %arg0, %c0_i32, %c0_i32_0 : i32, i32, i32
  }
}

</mosaic_0001>

<bundles_post_ra>
// kernel: upsample_conv2d_pixel_shuffle.1
= control target key start
LH: loop header
LB: loop body
LE: loop exit
PB: predicated region body
PF: predicated region fallthrough
CT: control target
= control target key end

     0   :  { %v18_v0 = vlaneseq  ;;  %v948_v2 = vmov 1983009808   ;;  %s949_s11 = smov 112   ;;  %s950_s12 = smov 111   ;;  %vm117_vm0 = vcmask 916480   ;;  %vm129_vm1 = vcmask 908288   ;;  %s1474_s0 = inlined_call_operand.vmem [shape: bf16[1,2,4,512], index: 0, kind: input, shape index: {}]   ;;  %s1475_s1 = inlined_call_operand.vmem [shape: bf16[16,112], index: 1, kind: input, shape index: {}]   ;;  %s1476_s2 = inlined_call_operand.vmem [shape: f32[1,16,768], index: 2, kind: output, shape index: {}]  }
   0x1   :  { %v12_v1 = vld [vmem:[%s1474_s0] sm:$0xff]  ;;  %v16_v3 = vunpack.c.l.s4 %v948_v2  ;;  %s951_s13 = smov 110   ;;  %s952_s14 = smov 127   ;;  %v923_v17 = vld [vmem:[%s1474_s0 + $0x8] sm:$0xff]  ;;  %vm78_vm2 = vcmask 1041408   ;;  %vm141_vm3 = vcmask 900096  }
   0x2   :  { %v19_v4 = vshrl.u32 %v18_v0, 7  ;;  %v30_v6 = vcombine.low %v12_v1, %v12_v1  ;;  %v14_v8 = vcombine.high %v12_v1, %v12_v1  ;;  %s953_s15 = smov 126   ;;  %s954_s16 = smov 125   ;;  %v377_v18 = vcombine.low %v923_v17, %v923_v17 }
   0x3   :  { %v17_v5 = vunpack.c.0.s8 %v16_v3  ;;  %s955_s19 = smov 84   ;;  %v361_v23 = vcombine.high %v923_v17, %v923_v17  ;;  %vm88_vm4 = vcmask 1043456   ;;  %vm95_vm5 = vcmask 1045504   ;;  %s956_s0 = smov 124  }
   0x4   :  { %vm47_vm6 = vcmask 1039360   ;;  %s957_s20 = smov 105   ;;  %vm61_vm7 = vcmask 1031168   ;;  %s958_s21 = smov 86   ;;  %vm74_vm8 = vcmask 1022976   ;;  %vm300_vm9 = vcmask 687104  }
   0x5   :  { %v20_v7 = vsub.s32 %v17_v5, %v19_v4  ;;  %s959_s22 = smov 67   ;;  %s960_s23 = smov 48   ;;  %vm182_vm10 = vcmask 1014784   ;;  %vm214_vm11 = vcmask 859136   ;;  %vm242_vm12 = vcmask 703488  }
   0x6   :  { %s962_s24 = smov 44   ;;  %vm266_vm13 = vcmask 547840   ;;  %vm284_vm14 = vcmask 392192   ;;  %vm348_vm15 = vcmask 359424  }
   0x7   :  { %v37_v9 = vrot.slane %v30_v6, %v20_v7  ;;  %v981_v10 = vrot.slane %v12_v1, %v20_v7  ;;  %v990_v12 = vrot.slane %v14_v8, %v20_v7  ;;  %v384_v19 = vrot.slane %v377_v18, %v20_v7 }
   0x8   :  { %v1037_v20 = vrot.slane %v923_v17, %v20_v7  ;;  %v1051_v25 = vrot.slane %v361_v23, %v20_v7 }
   0x9   :  { %109 = vrot.lane.b32.xlu1 %v37_v9, %s949_s11  ;;  %113 = vrot.lane.b32.xlu0 %v981_v10, %s949_s11  ;;  %v988_v11 = vcombine.high %v981_v10, %v981_v10  ;;  %v38_v13 = vcombine.high %v37_v9, %v37_v9  ;;  %v52_v14 = vcombine.low %v990_v12, %v990_v12 }
   0xa   :  { %v51_v15 = vcombine.low %v981_v10, %v981_v10  ;;  %v65_v16 = vcombine.low %v37_v9, %v37_v9  ;;  %v385_v21 = vcombine.high %v384_v19, %v384_v19  ;;  %v1043_v22 = vcombine.high %v1037_v20, %v1037_v20 }
   0xb   :  { %v397_v24 = vcombine.low %v1037_v20, %v1037_v20  ;;  %v398_v26 = vcombine.low %v1051_v25, %v1051_v25  ;;  %v410_v27 = vcombine.low %v384_v19, %v384_v19  ;;  %v1128_v62 = vcombine.high %v990_v12, %v990_v12 }
   0xd   :  { %123 = vrot.lane.b32.xlu0 %v981_v10, %s950_s12  ;;  %115 = vrot.lane.b32.xlu1 %v988_v11, %s949_s11 }
  0x11   :  { %111 = vrot.lane.b32.xlu0 %v38_v13, %s949_s11  ;;  %125 = vrot.lane.b32.xlu1 %v52_v14, %s950_s12 }
  0x15   :  { %127 = vrot.lane.b32.xlu0 %v990_v12, %s950_s12  ;;  %121 = vrot.lane.b32.xlu1 %v51_v15, %s950_s12 }
  0x19   :  { %135 = vrot.lane.b32.xlu0 %v37_v9, %s951_s13  ;;  %137 = vrot.lane.b32.xlu1 %v51_v15, %s951_s13 }
  0x1d   :  { %139 = vrot.lane.b32.xlu0 %v981_v10, %s951_s13  ;;  %133 = vrot.lane.b32.xlu1 %v65_v16, %s951_s13 }
  0x21   :  { %41 = vrot.lane.b32.xlu0 %v38_v13, %s952_s14  ;;  %43 = vrot.lane.b32.xlu1 %v981_v10, %s952_s14 }
  0x25   :  { %45 = vrot.lane.b32.xlu0 %v988_v11, %s952_s14  ;;  %39 = vrot.lane.b32.xlu1 %v37_v9, %s952_s14 }
  0x29   :  { %55 = vrot.lane.b32.xlu0 %v981_v10, %s953_s15  ;;  %57 = vrot.lane.b32.xlu1 %v52_v14, %s953_s15 }
  0x2d   :  { %59 = vrot.lane.b32.xlu0 %v990_v12, %s953_s15  ;;  %53 = vrot.lane.b32.xlu1 %v51_v15, %s953_s15 }
  0x31   :  { %68 = vrot.lane.b32.xlu0 %v37_v9, %s954_s16  ;;  %70 = vrot.lane.b32.xlu1 %v51_v15, %s954_s16 }
  0x35   :  { %72 = vrot.lane.b32.xlu0 %v981_v10, %s954_s16  ;;  %66 = vrot.lane.b32.xlu1 %v65_v16, %s954_s16 }
  0x39   :  { %294 = vrot.lane.b32.xlu0 %v37_v9, %s955_s19  ;;  %296 = vrot.lane.b32.xlu1 %v38_v13, %s955_s19 }
  0x3d   :  { %298 = vrot.lane.b32.xlu0 %v981_v10, %s955_s19  ;;  %303 = vrot.lane.b32.xlu1 %v51_v15, %s955_s19 }
  0x41   :  { %305 = vrot.lane.b32.xlu0 %v52_v14, %s955_s19  ;;  %309 = vrot.lane.b32.xlu1 %v65_v16, %s955_s19 }
  0x45   :  { %450 = vrot.lane.b32.xlu0 %v384_v19, %s949_s11  ;;  %452 = vrot.lane.b32.xlu1 %v385_v21, %s949_s11 }
  0x49   :  { %454 = vrot.lane.b32.xlu0 %v1037_v20, %s949_s11  ;;  %456 = vrot.lane.b32.xlu1 %v1043_v22, %s949_s11 }
  0x4d   :  { %461 = vrot.lane.b32.xlu0 %v397_v24, %s950_s12  ;;  %463 = vrot.lane.b32.xlu1 %v1037_v20, %s950_s12 }
  0x51   :  { %465 = vrot.lane.b32.xlu0 %v398_v26, %s950_s12  ;;  %467 = vrot.lane.b32.xlu1 %v1051_v25, %s950_s12 }
  0x55   :  { %472 = vrot.lane.b32.xlu0 %v410_v27, %s951_s13  ;;  %474 = vrot.lane.b32.xlu1 %v384_v19, %s951_s13 }
  0x59   :  { %476 = vrot.lane.b32.xlu0 %v397_v24, %s951_s13  ;;  %478 = vrot.lane.b32.xlu1 %v1037_v20, %s951_s13 }
  0x5d   :  { %386 = vrot.lane.b32.xlu0 %v384_v19, %s952_s14  ;;  %388 = vrot.lane.b32.xlu1 %v385_v21, %s952_s14 }
  0x61   :  { %390 = vrot.lane.b32.xlu0 %v1037_v20, %s952_s14  ;;  %392 = vrot.lane.b32.xlu1 %v1043_v22, %s952_s14 }
  0x65   :  { %399 = vrot.lane.b32.xlu0 %v397_v24, %s953_s15  ;;  %401 = vrot.lane.b32.xlu1 %v1037_v20, %s953_s15 }
  0x69   :  { %403 = vrot.lane.b32.xlu0 %v398_v26, %s953_s15  ;;  %405 = vrot.lane.b32.xlu1 %v1051_v25, %s953_s15 }
  0x6d   :  { %411 = vrot.lane.b32.xlu0 %v410_v27, %s954_s16  ;;  %413 = vrot.lane.b32.xlu1 %v384_v19, %s954_s16 }
  0x71   :  { %415 = vrot.lane.b32.xlu0 %v397_v24, %s954_s16  ;;  %417 = vrot.lane.b32.xlu1 %v1037_v20, %s954_s16 }
  0x75   :  { %627 = vrot.lane.b32.xlu0 %v384_v19, %s955_s19  ;;  %629 = vrot.lane.b32.xlu1 %v385_v21, %s955_s19 }
  0x79   :  { %631 = vrot.lane.b32.xlu0 %v1037_v20, %s955_s19  ;;  %635 = vrot.lane.b32.xlu1 %v397_v24, %s955_s19 }
  0x7b   :  { %v110_v28 = vpop.permute.xlu1 %109  ;;  %v114_v29 = vpop.permute.xlu0 %113 }
  0x7d   :  { %637 = vrot.lane.b32.xlu0 %v398_v26, %s955_s19  ;;  %641 = vrot.lane.b32.xlu1 %v410_v27, %s955_s19 }
  0x7f   :  { %v124_v30 = vpop.permute.xlu0 %123  ;;  %v1090_v31 = vpop.permute.xlu1 %115 }
  0x80   :  { %v120_v41 = vsel %vm117_vm0, %v114_v29, %v1090_v31 }
  0x81   :  { %v150_v48 = vsel %vm78_vm2, %v990_v12, %v120_v41 }
  0x83   :  { %v112_v32 = vpop.permute.xlu0 %111  ;;  %v126_v33 = vpop.permute.xlu1 %125 }
  0x84   :  { %v119_v34 = vsel %vm117_vm0, %v112_v32, %v114_v29  ;;  %v131_v38 = vsel %vm129_vm1, %v124_v30, %v126_v33  ;;  %v118_v42 = vsel %vm117_vm0, %v110_v28, %v112_v32 }
  0x85   :  { %v148_v37 = vsel %vm78_vm2, %v988_v11, %v119_v34  ;;  %v146_v49 = vsel %vm78_vm2, %v981_v10, %v118_v42 }
  0x86   :  { %v157_v44 = vsel %vm88_vm4, %v148_v37, %v131_v38 }
  0x87   :  { %v1093_v35 = vpop.permute.xlu0 %127  ;;  %v122_v36 = vpop.permute.xlu1 %121 }
  0x88   :  { %v132_v45 = vsel %vm129_vm1, %v126_v33, %v1093_v35  ;;  %v130_v46 = vsel %vm129_vm1, %v122_v36, %v124_v30 }
  0x89   :  { %v159_v54 = vsel %vm88_vm4, %v150_v48, %v132_v45  ;;  %v155_v55 = vsel %vm88_vm4, %v146_v49, %v130_v46 }
  0x8b   :  { %v136_v39 = vpop.permute.xlu0 %135  ;;  %v138_v40 = vpop.permute.xlu1 %137 }
  0x8c   :  { %v143_v43 = vsel %vm141_vm3, %v136_v39, %v138_v40 }
  0x8d   :  { %v165_v47 = vsel %vm95_vm5, %v157_v44, %v143_v43 }
  0x8e   :  { %176 = vrot.lane.b32.xlu0 %v165_v47, %s956_s0 }
  0x8f   :  { %v1112_v50 = vpop.permute.xlu0 %139  ;;  %v134_v51 = vpop.permute.xlu1 %133 }
  0x90   :  { %v142_v52 = vsel %vm141_vm3, %v134_v51, %v136_v39  ;;  %v144_v53 = vsel %vm141_vm3, %v138_v40, %v1112_v50 }
  0x91   :  { %v167_v56 = vsel %vm95_vm5, %v159_v54, %v144_v53  ;;  %v163_v57 = vsel %vm95_vm5, %v155_v55, %v142_v52  ;;  %v961_v55 = vmov 0  }
  0x92   :  { %178 = vrot.lane.b32.xlu1 %v167_v56, %s956_s0  ;;  %174 = vrot.lane.b32.xlu0 %v163_v57, %s956_s0 }
  0x93   :  { %v42_v58 = vpop.permute.xlu0 %41  ;;  %v44_v59 = vpop.permute.xlu1 %43  ;;  %774 = vmatprep.mubr.bf16.mxu0 %v961_v55  ;;  %817 = vmatprep.mubr.bf16.mxu1 %v961_v55 }
  0x94   :  { %v49_v60 = vsel %vm47_vm6, %v42_v58, %v44_v59 }
  0x95   :  { %v84_v61 = vsel %vm78_vm2, %v988_v11, %v49_v60 }
  0x96   :  { %v195_v63 = vsel %vm88_vm4, %v84_v61, %v131_v38 }
  0x97   :  { %v46_v0 = vpop.permute.xlu0 %45  ;;  %v40_v1 = vpop.permute.xlu1 %39  ;;  %v199_v2 = vsel %vm95_vm5, %v195_v63, %v143_v43 }
  0x98   :  { %v50_v3 = vsel %vm47_vm6, %v44_v59, %v46_v0  ;;  %v193_v4 = vsel %vm78_vm2, %v1128_v62, %v46_v0  ;;  %v48_v5 = vsel %vm47_vm6, %v40_v1, %v42_v58  ;;  %208 = vrot.lane.b32.xlu1 %v199_v2, %s957_s20 }
  0x99   :  { %v87_v6 = vsel %vm78_vm2, %v990_v12, %v50_v3  ;;  %v81_v7 = vsel %vm78_vm2, %v981_v10, %v48_v5  ;;  %v197_v8 = vsel %vm88_vm4, %v193_v4, %v1093_v35 }
  0x9a   :  { %v196_v9 = vsel %vm88_vm4, %v87_v6, %v132_v45  ;;  %v194_v13 = vsel %vm88_vm4, %v81_v7, %v130_v46  ;;  %v1147_v14 = vsel %vm95_vm5, %v197_v8, %v1112_v50 }
  0x9b   :  { %v56_v15 = vpop.permute.xlu0 %55  ;;  %v58_v16 = vpop.permute.xlu1 %57  ;;  %v200_v17 = vsel %vm95_vm5, %v196_v9, %v144_v53  ;;  %v198_v18 = vsel %vm95_vm5, %v194_v13, %v142_v52 }
  0x9c   :  { %v63_v19 = vsel %vm61_vm7, %v56_v15, %v58_v16  ;;  %210 = vrot.lane.b32.xlu0 %v200_v17, %s957_s20  ;;  %206 = vrot.lane.b32.xlu1 %v198_v18, %s957_s20 }
  0x9d   :  { %v92_v21 = vsel %vm88_vm4, %v84_v61, %v63_v19 }
  0x9e   :  { %v227_v23 = vsel %vm95_vm5, %v92_v21, %v143_v43 }
  0x9f   :  { %v60_v24 = vpop.permute.xlu0 %59  ;;  %v54_v26 = vpop.permute.xlu1 %53 }
  0xa0   :  { %v64_v27 = vsel %vm61_vm7, %v58_v16, %v60_v24  ;;  %v225_v28 = vsel %vm88_vm4, %v193_v4, %v60_v24  ;;  %v62_v29 = vsel %vm61_vm7, %v54_v26, %v56_v15  ;;  %236 = vrot.lane.b32.xlu0 %v227_v23, %s958_s21 }
  0xa1   :  { %v94_v30 = vsel %vm88_vm4, %v87_v6, %v64_v27  ;;  %v90_v32 = vsel %vm88_vm4, %v81_v7, %v62_v29  ;;  %v1164_v33 = vsel %vm95_vm5, %v225_v28, %v1112_v50 }
  0xa2   :  { %v228_v34 = vsel %vm95_vm5, %v94_v30, %v144_v53  ;;  %v226_v36 = vsel %vm95_vm5, %v90_v32, %v142_v52 }
  0xa3   :  { %v69_v37 = vpop.permute.xlu0 %68  ;;  %238 = vrot.lane.b32.xlu1 %v228_v34, %s958_s21  ;;  %v71_v38 = vpop.permute.xlu1 %70 }
  0xa4   :  { %v76_v39 = vsel %vm74_vm8, %v69_v37, %v71_v38  ;;  %234 = vrot.lane.b32.xlu0 %v226_v36, %s958_s21 }
  0xa5   :  { %v100_v40 = vsel %vm95_vm5, %v92_v21, %v76_v39  ;;  %v1237_v39 = vcombine.high %v1051_v25, %v1051_v25 }
  0xa6   :  { %742 = vmatprep.subr.bf16.mxu0 %v100_v40 }
  0xa7   :  { %v73_v41 = vpop.permute.xlu0 %72  ;;  %260 = vrot.lane.b32.xlu1 %v100_v40, %s959_s22  ;;  %v67_v42 = vpop.permute.xlu1 %66 }
  0xa8   :  { %v77_v43 = vsel %vm74_vm8, %v71_v38, %v73_v41  ;;  %v75_v44 = vsel %vm74_vm8, %v67_v42, %v69_v37  ;;  %v1176_v45 = vsel %vm95_vm5, %v225_v28, %v73_v41 }
  0xa9   :  { %v1179_v46 = vsel %vm95_vm5, %v94_v30, %v77_v43  ;;  %v97_v47 = vsel %vm95_vm5, %v90_v32, %v75_v44 }
  0xaa   :  { %262 = vrot.lane.b32.xlu0 %v1179_v46, %s959_s22  ;;  %743 = vmatpush1.bf16.msra.mxu0 %v97_v47 }
  0xab   :  { %v295_v48 = vpop.permute.xlu0 %294  ;;  %258 = vrot.lane.b32.xlu1 %v97_v47, %s959_s22  ;;  %v297_v49 = vpop.permute.xlu1 %296 }
  0xac   :  { %v301_v51 = vsel %vm300_vm9, %v295_v48, %v297_v49  ;;  %v314_v7 = vsel %vm78_vm2, %v981_v10, %v295_v48 }
  0xad   :  { %v316_v57 = vsel %vm78_vm2, %v988_v11, %v301_v51 }
  0xae   :  { %278 = vrot.lane.b32.xlu0 %v100_v40, %s960_s23 }
  0xaf   :  { %v299_v52 = vpop.permute.xlu0 %298  ;;  %280 = vrot.lane.b32.xlu1 %v1179_v46, %s960_s23  ;;  %v304_v53 = vpop.permute.xlu1 %303 }
  0xb0   :  { %v307_v54 = vsel %vm300_vm9, %v304_v53, %v299_v52  ;;  %v302_v56 = vsel %vm300_vm9, %v297_v49, %v299_v52  ;;  %v320_v58 = vsel %vm78_vm2, %v1128_v62, %v299_v52  ;;  %v312_v3 = vsel %vm300_vm9, %v295_v48, %v304_v53 }
  0xb1   :  { %v324_v61 = vsel %vm88_vm4, %v316_v57, %v307_v54  ;;  %v318_v2 = vsel %vm78_vm2, %v990_v12, %v302_v56  ;;  %v322_v9 = vsel %vm88_vm4, %v314_v7, %v304_v53 }
  0xb2   :  { %276 = vrot.lane.b32.xlu0 %v97_v47, %s960_s23 }
  0xb3   :  { %v306_v59 = vpop.permute.xlu0 %305  ;;  %v310_v60 = vpop.permute.xlu1 %309 }
  0xb4   :  { %v308_v63 = vsel %vm300_vm9, %v299_v52, %v306_v59  ;;  %v328_v0 = vsel %vm88_vm4, %v320_v58, %v306_v59  ;;  %v311_v1 = vsel %vm300_vm9, %v310_v60, %v295_v48  ;;  %v330_v13 = vsel %vm95_vm5, %v322_v9, %v310_v60 }
  0xb5   :  { %v332_v11 = vsel %vm95_vm5, %v324_v61, %v311_v1  ;;  %v326_v4 = vsel %vm88_vm4, %v318_v2, %v308_v63  ;;  %v1208_v5 = vsel %vm95_vm5, %v328_v0, %v304_v53  ;;  %v153_v52 = vsel %vm78_vm2, %v1128_v62, %v1090_v31 }
  0xb6   :  { %342 = vrot.lane.b32.xlu1 %v332_v11, %s962_s24  ;;  %v334_v6 = vsel %vm95_vm5, %v326_v4, %v312_v3  ;;  %v161_v59 = vsel %vm88_vm4, %v153_v52, %v1093_v35 }
  0xb7   :  { %v451_v8 = vpop.permute.xlu0 %450  ;;  %344 = vrot.lane.b32.xlu0 %v334_v6, %s962_s24  ;;  %v453_v12 = vpop.permute.xlu1 %452  ;;  %v169_v31 = vsel %vm95_vm5, %v161_v59, %v1112_v50 }
  0xb8   :  { %v458_v23 = vsel %vm117_vm0, %v451_v8, %v453_v12 }
  0xb9   :  { %v484_v24 = vsel %vm78_vm2, %v1037_v20, %v458_v23 }
  0xba   :  { %340 = vrot.lane.b32.xlu1 %v330_v13, %s962_s24 }
  0xbb   :  { %v455_v15 = vpop.permute.xlu0 %454  ;;  %v457_v16 = vpop.permute.xlu1 %456 }
  0xbc   :  { %v459_v28 = vsel %vm117_vm0, %v453_v12, %v455_v15  ;;  %v460_v29 = vsel %vm117_vm0, %v455_v15, %v457_v16  ;;  %v491_v53 = vsel %vm78_vm2, %v1237_v39, %v457_v16 }
  0xbd   :  { %v486_v38 = vsel %vm78_vm2, %v1043_v22, %v459_v28  ;;  %v488_v40 = vsel %vm78_vm2, %v1051_v25, %v460_v29 }
  0xbf   :  { %v462_v17 = vpop.permute.xlu0 %461  ;;  %v464_v18 = vpop.permute.xlu1 %463 }
  0xc0   :  { %v469_v10 = vsel %vm129_vm1, %v462_v17, %v464_v18 }
  0xc1   :  { %v493_v32 = vsel %vm88_vm4, %v484_v24, %v469_v10 }
  0xc3   :  { %v466_v19 = vpop.permute.xlu0 %465  ;;  %v468_v21 = vpop.permute.xlu1 %467 }
  0xc4   :  { %v470_v34 = vsel %vm129_vm1, %v464_v18, %v466_v19  ;;  %v471_v36 = vsel %vm129_vm1, %v466_v19, %v468_v21  ;;  %v499_v57 = vsel %vm88_vm4, %v491_v53, %v468_v21 }
  0xc5   :  { %v495_v44 = vsel %vm88_vm4, %v486_v38, %v470_v34  ;;  %v497_v48 = vsel %vm88_vm4, %v488_v40, %v471_v36 }
  0xc7   :  { %v473_v26 = vpop.permute.xlu0 %472  ;;  %v475_v27 = vpop.permute.xlu1 %474 }
  0xc8   :  { %v1225_v30 = vsel %vm141_vm3, %v473_v26, %v475_v27 }
  0xc9   :  { %v501_v37 = vsel %vm95_vm5, %v493_v32, %v1225_v30 }
  0xca   :  { %512 = vrot.lane.b32.xlu0 %v501_v37, %s956_s0 }
  0xcb   :  { %v477_v41 = vpop.permute.xlu0 %476  ;;  %v1241_v42 = vpop.permute.xlu1 %478 }
  0xcc   :  { %v481_v43 = vsel %vm141_vm3, %v475_v27, %v477_v41  ;;  %v482_v47 = vsel %vm141_vm3, %v477_v41, %v1241_v42  ;;  %v507_v61 = vsel %vm95_vm5, %v499_v57, %v1241_v42 }
  0xcd   :  { %v503_v49 = vsel %vm95_vm5, %v495_v44, %v481_v43  ;;  %v505_v51 = vsel %vm95_vm5, %v497_v48, %v482_v47 }
  0xce   :  { %514 = vrot.lane.b32.xlu1 %v503_v49, %s956_s0  ;;  %516 = vrot.lane.b32.xlu0 %v505_v51, %s956_s0 }
  0xcf   :  { %v387_v54 = vpop.permute.xlu0 %386  ;;  %v389_v56 = vpop.permute.xlu1 %388 }
  0xd0   :  { %v394_v58 = vsel %vm47_vm6, %v387_v54, %v389_v56 }
  0xd1   :  { %v424_v60 = vsel %vm78_vm2, %v1037_v20, %v394_v58 }
  0xd2   :  { %518 = vrot.lane.b32.xlu1 %v507_v61, %s956_s0  ;;  %180 = vrot.lane.b32.xlu0 %v169_v31, %s956_s0  ;;  %v531_v62 = vsel %vm88_vm4, %v424_v60, %v469_v10 }
  0xd3   :  { %v391_v63 = vpop.permute.xlu0 %390  ;;  %v393_v0 = vpop.permute.xlu1 %392  ;;  %v535_v3 = vsel %vm95_vm5, %v531_v62, %v1225_v30 }
  0xd4   :  { %v395_v1 = vsel %vm47_vm6, %v389_v56, %v391_v63  ;;  %v396_v35 = vsel %vm47_vm6, %v391_v63, %v393_v0  ;;  %v530_v50 = vsel %vm78_vm2, %v1237_v39, %v393_v0 }
  0xd5   :  { %v427_v2 = vsel %vm78_vm2, %v1043_v22, %v395_v1  ;;  %v430_v11 = vsel %vm78_vm2, %v1051_v25, %v396_v35  ;;  %v534_v13 = vsel %vm88_vm4, %v530_v50, %v468_v21 }
  0xd6   :  { %543 = vrot.lane.b32.xlu1 %v535_v3, %s957_s20  ;;  %v532_v4 = vsel %vm88_vm4, %v427_v2, %v470_v34  ;;  %v533_v6 = vsel %vm88_vm4, %v430_v11, %v471_v36  ;;  %v538_v18 = vsel %vm95_vm5, %v534_v13, %v1241_v42 }
  0xd7   :  { %v400_v7 = vpop.permute.xlu0 %399  ;;  %v402_v8 = vpop.permute.xlu1 %401  ;;  %v536_v12 = vsel %vm95_vm5, %v532_v4, %v481_v43  ;;  %v537_v9 = vsel %vm95_vm5, %v533_v6, %v482_v47 }
  0xd8   :  { %545 = vrot.lane.b32.xlu0 %v536_v12, %s957_s20  ;;  %v407_v15 = vsel %vm61_vm7, %v400_v7, %v402_v8 }
  0xd9   :  { %v432_v10 = vsel %vm88_vm4, %v424_v60, %v407_v15 }
  0xda   :  { %547 = vrot.lane.b32.xlu1 %v537_v9, %s957_s20  ;;  %v562_v32 = vsel %vm95_vm5, %v432_v10, %v1225_v30 }
  0xdb   :  { %v404_v16 = vpop.permute.xlu0 %403  ;;  %v406_v17 = vpop.permute.xlu1 %405 }
  0xdc   :  { %v408_v19 = vsel %vm61_vm7, %v402_v8, %v404_v16  ;;  %v409_v23 = vsel %vm61_vm7, %v404_v16, %v406_v17  ;;  %549 = vrot.lane.b32.xlu0 %v538_v18, %s957_s20  ;;  %v561_v37 = vsel %vm88_vm4, %v530_v50, %v406_v17 }
  0xdd   :  { %v434_v24 = vsel %vm88_vm4, %v427_v2, %v408_v19  ;;  %v436_v21 = vsel %vm88_vm4, %v430_v11, %v409_v23  ;;  %v565_v30 = vsel %vm95_vm5, %v561_v37, %v1241_v42 }
  0xde   :  { %212 = vrot.lane.b32.xlu1 %v1147_v14, %s957_s20  ;;  %v563_v26 = vsel %vm95_vm5, %v434_v24, %v481_v43  ;;  %v564_v27 = vsel %vm95_vm5, %v436_v21, %v482_v47 }
  0xdf   :  { %v412_v28 = vpop.permute.xlu0 %411  ;;  %v414_v29 = vpop.permute.xlu1 %413 }
  0xe0   :  { %v419_v34 = vsel %vm74_vm8, %v412_v28, %v414_v29  ;;  %570 = vrot.lane.b32.xlu0 %v562_v32, %s958_s21 }
  0xe1   :  { %v438_v36 = vsel %vm95_vm5, %v432_v10, %v419_v34 }
  0xe2   :  { %572 = vrot.lane.b32.xlu1 %v563_v26, %s958_s21  ;;  %785 = vmatprep.subr.bf16.mxu1 %v438_v36 }
  0xe3   :  { %v416_v14 = vpop.permute.xlu0 %415  ;;  %786 = vmatpush1.bf16.msra.mxu1 %v1179_v46  ;;  %v418_v38 = vpop.permute.xlu1 %417 }
  0xe4   :  { %v420_v40 = vsel %vm74_vm8, %v414_v29, %v416_v14  ;;  %v421_v41 = vsel %vm74_vm8, %v416_v14, %v418_v38  ;;  %574 = vrot.lane.b32.xlu0 %v564_v27, %s958_s21  ;;  %v588_v42 = vsel %vm95_vm5, %v561_v37, %v418_v38  ;;  %v1398_v37 = vld [vmem:[%s1475_s1] sm:$0xff]  }
  0xe5   :  { %v1315_v43 = vsel %vm95_vm5, %v434_v24, %v420_v40  ;;  %v1318_v44 = vsel %vm95_vm5, %v436_v21, %v421_v41 }
  0xe6   :  { %576 = vrot.lane.b32.xlu1 %v565_v30, %s958_s21 }
  0xe7   :  { %v628_v46 = vpop.permute.xlu0 %627  ;;  %v630_v47 = vpop.permute.xlu1 %629 }
  0xe8   :  { %240 = vrot.lane.b32.xlu0 %v1164_v33, %s958_s21  ;;  %v633_v33 = vsel %vm300_vm9, %v628_v46, %v630_v47  ;;  %v646_v51 = vsel %vm78_vm2, %v1037_v20, %v628_v46 }
  0xe9   :  { %v648_v54 = vsel %vm78_vm2, %v1043_v22, %v633_v33 }
  0xea   :  { %593 = vrot.lane.b32.xlu1 %v438_v36, %s959_s22 }
  0xeb   :  { %v632_v48 = vpop.permute.xlu0 %631  ;;  %v636_v49 = vpop.permute.xlu1 %635 }
  0xec   :  { %595 = vrot.lane.b32.xlu0 %v1315_v43, %s959_s22  ;;  %v634_v52 = vsel %vm300_vm9, %v630_v47, %v632_v48  ;;  %v639_v56 = vsel %vm300_vm9, %v636_v49, %v632_v48  ;;  %v654_v58 = vsel %vm88_vm4, %v646_v51, %v636_v49  ;;  %v652_v22 = vsel %vm78_vm2, %v1237_v39, %v632_v48 }
  0xed   :  { %v650_v20 = vsel %vm78_vm2, %v1051_v25, %v634_v52  ;;  %v656_v61 = vsel %vm88_vm4, %v648_v54, %v639_v56  ;;  %v644_v63 = vsel %vm300_vm9, %v628_v46, %v636_v49 }
  0xee   :  { %597 = vrot.lane.b32.xlu1 %v1318_v44, %s959_s22 }
  0xef   :  { %v638_v53 = vpop.permute.xlu0 %637  ;;  %v642_v57 = vpop.permute.xlu1 %641 }
  0xf0   :  { %599 = vrot.lane.b32.xlu0 %v588_v42, %s959_s22  ;;  %v640_v59 = vsel %vm300_vm9, %v632_v48, %v638_v53  ;;  %v643_v60 = vsel %vm300_vm9, %v642_v57, %v628_v46  ;;  %v662_v31 = vsel %vm95_vm5, %v654_v58, %v642_v57  ;;  %v660_v0 = vsel %vm88_vm4, %v652_v22, %v638_v53 }
  0xf1   :  { %v658_v62 = vsel %vm88_vm4, %v650_v20, %v640_v59  ;;  %v664_v25 = vsel %vm95_vm5, %v656_v61, %v643_v60  ;;  %v667_v39 = vsel %vm95_vm5, %v660_v0, %v636_v49 }
  0xf2   :  { %264 = vrot.lane.b32.xlu1 %v1176_v45, %s959_s22 }
  0xf4   :  { %610 = vrot.lane.b32.xlu0 %v438_v36, %s960_s23 }
  0xf6   :  { %612 = vrot.lane.b32.xlu1 %v1315_v43, %s960_s23 }
  0xf8   :  { %614 = vrot.lane.b32.xlu0 %v1318_v44, %s960_s23 }
  0xfa   :  { %616 = vrot.lane.b32.xlu1 %v588_v42, %s960_s23 }
  0xfc   :  { %282 = vrot.lane.b32.xlu0 %v1176_v45, %s960_s23  ;;  %v666_v45 = vsel %vm95_vm5, %v658_v62, %v644_v63 }
  0xfe   :  { %672 = vrot.lane.b32.xlu1 %v662_v31, %s962_s24 }
 0x100   :  { %v177_v1 = vpop.permute.xlu0 %176  ;;  %674 = vrot.lane.b32.xlu0 %v664_v25, %s962_s24 }
 0x102   :  { %676 = vrot.lane.b32.xlu1 %v666_v45, %s962_s24 }
 0x104   :  { %v175_v35 = vpop.permute.xlu0 %174  ;;  %678 = vrot.lane.b32.xlu0 %v667_v39, %s962_s24  ;;  %v179_v2 = vpop.permute.xlu1 %178 }
 0x105   :  { %v184_v11 = vsel %vm182_vm10, %v177_v1, %v179_v2  ;;  %v183_v50 = vsel %vm182_vm10, %v175_v35, %v177_v1 }
 0x106   :  { %346 = vrot.lane.b32.xlu1 %v1208_v5, %s962_s24  ;;  %744 = vmatprep.subr.bf16.mxu0 %v184_v11 }
 0x107   :  { %745 = vmatpush1.bf16.msra.mxu0 %v183_v50 }
 0x10a   :  { %v209_v3 = vpop.permute.xlu1 %208 }
 0x10e   :  { %v1370_v4 = vpop.permute.xlu0 %210  ;;  %v207_v6 = vpop.permute.xlu1 %206 }
 0x10f   :  { %v216_v7 = vsel %vm214_vm11, %v209_v3, %v1370_v4  ;;  %v215_v8 = vsel %vm214_vm11, %v207_v6, %v209_v3 }
 0x110   :  { %746 = vmatprep.subr.bf16.mxu0 %v216_v7 }
 0x111   :  { %747 = vmatpush1.bf16.msra.mxu0 %v215_v8 }
 0x112   :  { %v237_v12 = vpop.permute.xlu0 %236 }
 0x115   :  { %v1375_v9 = vpop.permute.xlu1 %238 }
 0x116   :  { %v235_v13 = vpop.permute.xlu0 %234  ;;  %v244_v5 = vsel %vm242_vm12, %v237_v12, %v1375_v9 }
 0x117   :  { %748 = vmatprep.subr.bf16.mxu0 %v244_v5  ;;  %v243_v15 = vsel %vm242_vm12, %v235_v13, %v237_v12 }
 0x118   :  { %749 = vmatpush1.bf16.msra.mxu0 %v243_v15 }
 0x119   :  { %v261_v16 = vpop.permute.xlu1 %260 }
 0x11c   :  { %v1380_v17 = vpop.permute.xlu0 %262 }
 0x11d   :  { %v259_v18 = vpop.permute.xlu1 %258  ;;  %v268_v19 = vsel %vm266_vm13, %v261_v16, %v1380_v17 }
 0x11e   :  { %750 = vmatprep.subr.bf16.mxu0 %v268_v19  ;;  %v267_v23 = vsel %vm266_vm13, %v259_v18, %v261_v16 }
 0x11f   :  { %751 = vmatpush1.bf16.msra.mxu0 %v267_v23 }
 0x120   :  { %v279_v10 = vpop.permute.xlu0 %278 }
 0x121   :  { %v1385_v24 = vpop.permute.xlu1 %280 }
 0x122   :  { %v286_v21 = vsel %vm284_vm14, %v279_v10, %v1385_v24 }
 0x123   :  { %752 = vmatprep.subr.bf16.mxu0 %v286_v21 }
 0x124   :  { %v277_v26 = vpop.permute.xlu0 %276 }
 0x125   :  { %v285_v27 = vsel %vm284_vm14, %v277_v26, %v279_v10 }
 0x126   :  { %753 = vmatpush1.bf16.msra.mxu0 %v285_v27 }
 0x128   :  { %v343_v28 = vpop.permute.xlu1 %342 }
 0x129   :  { %v1390_v29 = vpop.permute.xlu0 %344 }
 0x12a   :  { %v350_v32 = vsel %vm348_vm15, %v343_v28, %v1390_v29 }
 0x12b   :  { %754 = vmatprep.subr.bf16.mxu0 %v350_v32 }
 0x12c   :  { %v341_v34 = vpop.permute.xlu1 %340 }
 0x12d   :  { %v349_v36 = vsel %vm348_vm15, %v341_v34, %v343_v28 }
 0x12e   :  { %755 = vmatpush1.bf16.msra.mxu0 %v349_v36 }
 0x12f   :  { %828 = vmatprep.subr.bf16.mxu0 %v1318_v44 }
 0x131   :  { %925 = vmatmul.mubr.msk.bf16.vlgmr.msra.gmra.mrb[0].mxu0 %vm117_vm0, %v1398_v37 }
 0x132   :  { %829 = vmatpush1.bf16.msra.mxu0 %v1315_v43  ;;  %860 = vmatprep.mubr.bf16.mxu0 %v961_v55 }
 0x13c   :  { %v513_v14 = vpop.permute.xlu0 %512 }
 0x140   :  { %v517_v38 = vpop.permute.xlu0 %516  ;;  %v515_v40 = vpop.permute.xlu1 %514 }
 0x141   :  { %v520_v41 = vsel %vm182_vm10, %v513_v14, %v515_v40  ;;  %v521_v44 = vsel %vm182_vm10, %v515_v40, %v517_v38 }
 0x142   :  { %787 = vmatprep.subr.bf16.mxu1 %v520_v41 }
 0x144   :  { %v181_v30 = vpop.permute.xlu0 %180  ;;  %v519_v46 = vpop.permute.xlu1 %518 }
 0x145   :  { %v185_v47 = vsel %vm182_vm10, %v179_v2, %v181_v30  ;;  %v522_v42 = vsel %vm182_vm10, %v517_v38, %v519_v46 }
 0x146   :  { %788 = vmatpush1.bf16.msra.mxu1 %v185_v47  ;;  %830 = vmatprep.subr.bf16.mxu0 %v522_v42 }
 0x147   :  { %831 = vmatpush1.bf16.msra.mxu0 %v521_v44 }
 0x148   :  { %v544_v43 = vpop.permute.xlu1 %543 }
 0x14a   :  { %v546_v48 = vpop.permute.xlu0 %545 }
 0x14b   :  { %v551_v55 = vsel %vm214_vm11, %v544_v43, %v546_v48 }
 0x14c   :  { %789 = vmatprep.subr.bf16.mxu1 %v551_v55  ;;  %v548_v49 = vpop.permute.xlu1 %547 }
 0x14d   :  { %v552_v52 = vsel %vm214_vm11, %v546_v48, %v548_v49 }
 0x14e   :  { %v550_v33 = vpop.permute.xlu0 %549 }
 0x14f   :  { %v553_v51 = vsel %vm214_vm11, %v548_v49, %v550_v33 }
 0x150   :  { %832 = vmatprep.subr.bf16.mxu0 %v553_v51  ;;  %v213_v53 = vpop.permute.xlu1 %212 }
 0x151   :  { %833 = vmatpush1.bf16.msra.mxu0 %v552_v52  ;;  %v217_v54 = vsel %vm214_vm11, %v1370_v4, %v213_v53 }
 0x152   :  { %v571_v56 = vpop.permute.xlu0 %570  ;;  %790 = vmatpush1.bf16.msra.mxu1 %v217_v54 }
 0x154   :  { %v573_v57 = vpop.permute.xlu1 %572 }
 0x155   :  { %v578_v58 = vsel %vm242_vm12, %v571_v56, %v573_v57 }
 0x156   :  { %v575_v59 = vpop.permute.xlu0 %574  ;;  %791 = vmatprep.subr.bf16.mxu1 %v578_v58 }
 0x157   :  { %v579_v61 = vsel %vm242_vm12, %v573_v57, %v575_v59 }
 0x158   :  { %v577_v20 = vpop.permute.xlu1 %576 }
 0x159   :  { %v580_v60 = vsel %vm242_vm12, %v575_v59, %v577_v20 }
 0x15a   :  { %v241_v22 = vpop.permute.xlu0 %240  ;;  %834 = vmatprep.subr.bf16.mxu0 %v580_v60 }
 0x15b   :  { %835 = vmatpush1.bf16.msra.mxu0 %v579_v61  ;;  %v245_v31 = vsel %vm242_vm12, %v1375_v9, %v241_v22 }
 0x15c   :  { %792 = vmatpush1.bf16.msra.mxu1 %v245_v31  ;;  %v594_v62 = vpop.permute.xlu1 %593 }
 0x15e   :  { %v596_v63 = vpop.permute.xlu0 %595 }
 0x15f   :  { %v601_v25 = vsel %vm266_vm13, %v594_v62, %v596_v63 }
 0x160   :  { %793 = vmatprep.subr.bf16.mxu1 %v601_v25  ;;  %v598_v0 = vpop.permute.xlu1 %597 }
 0x161   :  { %v602_v39 = vsel %vm266_vm13, %v596_v63, %v598_v0 }
 0x162   :  { %v600_v1 = vpop.permute.xlu0 %599 }
 0x163   :  { %v603_v45 = vsel %vm266_vm13, %v598_v0, %v600_v1 }
 0x164   :  { %836 = vmatprep.subr.bf16.mxu0 %v603_v45  ;;  %v265_v35 = vpop.permute.xlu1 %264 }
 0x165   :  { %837 = vmatpush1.bf16.msra.mxu0 %v602_v39  ;;  %v269_v2 = vsel %vm266_vm13, %v1380_v17, %v265_v35 }
 0x166   :  { %v611_v11 = vpop.permute.xlu0 %610  ;;  %794 = vmatpush1.bf16.msra.mxu1 %v269_v2 }
 0x168   :  { %v613_v50 = vpop.permute.xlu1 %612 }
 0x169   :  { %v618_v3 = vsel %vm284_vm14, %v611_v11, %v613_v50 }
 0x16a   :  { %v615_v4 = vpop.permute.xlu0 %614  ;;  %795 = vmatprep.subr.bf16.mxu1 %v618_v3 }
 0x16b   :  { %v619_v8 = vsel %vm284_vm14, %v613_v50, %v615_v4 }
 0x16c   :  { %v617_v6 = vpop.permute.xlu1 %616 }
 0x16d   :  { %v620_v7 = vsel %vm284_vm14, %v615_v4, %v617_v6 }
 0x16e   :  { %v283_v12 = vpop.permute.xlu0 %282  ;;  %838 = vmatprep.subr.bf16.mxu0 %v620_v7 }
 0x16f   :  { %839 = vmatpush1.bf16.msra.mxu0 %v619_v8  ;;  %v287_v9 = vsel %vm284_vm14, %v1385_v24, %v283_v12 }
 0x170   :  { %796 = vmatpush1.bf16.msra.mxu1 %v287_v9  ;;  %v673_v13 = vpop.permute.xlu1 %672 }
 0x172   :  { %v675_v5 = vpop.permute.xlu0 %674 }
 0x173   :  { %v680_v15 = vsel %vm348_vm15, %v673_v13, %v675_v5 }
 0x174   :  { %797 = vmatprep.subr.bf16.mxu1 %v680_v15  ;;  %v677_v16 = vpop.permute.xlu1 %676 }
 0x175   :  { %v681_v19 = vsel %vm348_vm15, %v675_v5, %v677_v16 }
 0x176   :  { %v679_v17 = vpop.permute.xlu0 %678 }
 0x177   :  { %v682_v18 = vsel %vm348_vm15, %v677_v16, %v679_v17 }
 0x178   :  { %840 = vmatprep.subr.bf16.mxu0 %v682_v18  ;;  %v347_v23 = vpop.permute.xlu1 %346 }
 0x179   :  { %841 = vmatpush1.bf16.msra.mxu0 %v681_v19  ;;  %v351_v10 = vsel %vm348_vm15, %v1390_v29, %v347_v23 }
 0x17a   :  { %798 = vmatpush1.bf16.msra.mxu1 %v351_v10 }
 0x17c   :  { %927 = vmatmul.mubr.msk.bf16.vlgmr.msra.gmra.mrb[4].mxu0 %vm117_vm0, %v1398_v37 }
 0x17d   :  { %926 = vmatmul.mubr.msk.bf16.vlgmr.msra.gmra.mrb[0].mxu1 %vm117_vm0, %v1398_v37 }
 0x204   :  { %v776_v24 = vpop.f32.mrb[0].mxu0 }
 0x205   :  { %vm871_vm1 = vcmp.ge.f32.partialorder %v776_v24, 0.0  ;;  %v883_v21 = vmul.f32 0.2, %v776_v24  ;;  %v778_v26 = vpop.f32.mrb[1].mxu0 }
 0x206   :  { %vm872_vm2 = vcmp.ge.f32.partialorder %v778_v26, 0.0  ;;  %v884_v27 = vmul.f32 0.2, %v778_v26  ;;  %v780_v28 = vpop.f32.mrb[2].mxu0 }
 0x207   :  { %v895_v32 = vsel %vm871_vm1, %v776_v24, %v883_v21  ;;  %vm877_vm3 = vcmp.ge.f32.partialorder %v780_v28, 0.0  ;;  %v889_v34 = vmul.f32 0.2, %v780_v28  ;;  %v782_v36 = vpop.f32.mrb[3].mxu0 }
 0x208   :  { %907 = vst [vmem:[%s1476_s2] sm:$0xff] %v895_v32  ;;  %v896_v29 = vsel %vm872_vm2, %v778_v26, %v884_v27  ;;  %vm878_vm4 = vcmp.ge.f32.partialorder %v782_v36, 0.0  ;;  %v890_v14 = vmul.f32 0.2, %v782_v36 }
 0x209   :  { %908 = vst [vmem:[%s1476_s2 + $0x8] sm:$0xff] %v896_v29  ;;  %v901_v37 = vsel %vm877_vm3, %v780_v28, %v889_v34 }
 0x20a   :  { %913 = vst [vmem:[%s1476_s2 + $0x30] sm:$0xff] %v901_v37  ;;  %v902_v38 = vsel %vm878_vm4, %v782_v36, %v890_v14 }
 0x20b   :  { %914 = vst [vmem:[%s1476_s2 + $0x38] sm:$0xff] %v902_v38 }
 0x24f   :  { %v862_v40 = vpop.f32.mrb[4].mxu0 }
 0x250   :  { %vm875_vm0 = vcmp.ge.f32.partialorder %v862_v40, 0.0  ;;  %v887_v41 = vmul.f32 0.2, %v862_v40  ;;  %v819_v30 = vpop.f32.mrb[0].mxu1  ;;  %v864_v46 = vpop.f32.mrb[5].mxu0 }
 0x251   :  { %vm873_vm5 = vcmp.ge.f32.partialorder %v819_v30, 0.0  ;;  %v885_v47 = vmul.f32 0.2, %v819_v30  ;;  %vm876_vm6 = vcmp.ge.f32.partialorder %v864_v46, 0.0  ;;  %v888_v42 = vmul.f32 0.2, %v864_v46 }
 0x252   :  { %v899_v44 = vsel %vm875_vm0, %v862_v40, %v887_v41  ;;  %v821_v43 = vpop.f32.mrb[1].mxu1  ;;  %v866_v48 = vpop.f32.mrb[6].mxu0 }
 0x253   :  { %911 = vst [vmem:[%s1476_s2 + $0x20] sm:$0xff] %v899_v44  ;;  %v897_v55 = vsel %vm873_vm5, %v819_v30, %v885_v47  ;;  %v900_v49 = vsel %vm876_vm6, %v864_v46, %v888_v42  ;;  %vm874_vm7 = vcmp.ge.f32.partialorder %v821_v43, 0.0  ;;  %v886_v33 = vmul.f32 0.2, %v821_v43  ;;  %v823_v51 = vpop.f32.mrb[2].mxu1  ;;  %v868_v52 = vpop.f32.mrb[7].mxu0 }
 0x254   :  { %909 = vst [vmem:[%s1476_s2 + $0x10] sm:$0xff] %v897_v55  ;;  %912 = vst [vmem:[%s1476_s2 + $0x28] sm:$0xff] %v900_v49  ;;  %vm881_vm8 = vcmp.ge.f32.partialorder %v866_v48, 0.0  ;;  %v893_v53 = vmul.f32 0.2, %v866_v48  ;;  %vm879_vm9 = vcmp.ge.f32.partialorder %v823_v51, 0.0 }
 0x255   :  { %v891_v54 = vmul.f32 0.2, %v823_v51  ;;  %v898_v56 = vsel %vm874_vm7, %v821_v43, %v886_v33  ;;  %vm882_vm10 = vcmp.ge.f32.partialorder %v868_v52, 0.0  ;;  %v894_v57 = vmul.f32 0.2, %v868_v52  ;;  %v825_v58 = vpop.f32.mrb[3].mxu1 }
 0x256   :  { %910 = vst [vmem:[%s1476_s2 + $0x18] sm:$0xff] %v898_v56  ;;  %v905_v59 = vsel %vm881_vm8, %v866_v48, %v893_v53  ;;  %vm880_vm11 = vcmp.ge.f32.partialorder %v825_v58, 0.0  ;;  %v892_v60 = vmul.f32 0.2, %v825_v58 }
 0x257   :  { %v903_v20 = vsel %vm879_vm9, %v823_v51, %v891_v54  ;;  %917 = vst [vmem:[%s1476_s2 + $0x50] sm:$0xff] %v905_v59  ;;  %v906_v61 = vsel %vm882_vm10, %v868_v52, %v894_v57 }
 0x258   :  { %915 = vst [vmem:[%s1476_s2 + $0x40] sm:$0xff] %v903_v20  ;;  %918 = vst [vmem:[%s1476_s2 + $0x58] sm:$0xff] %v906_v61  ;;  %v904_v22 = vsel %vm880_vm11, %v825_v58, %v892_v60 }
 0x259   :  { %916 = vst [vmem:[%s1476_s2 + $0x48] sm:$0xff] %v904_v22 }

</bundles_post_ra>
